<compile_context>
chip_gen: v7x
topology: tpu7x:2x2x1
jax: 0.10.0
libtpu: 0.0.40
codegen_flags: <defaults>
</compile_context>

<pallas_src>
import jax
import jax.numpy as jnp
from jax.experimental import pallas as pl
from jax.experimental.pallas import tpu as pltpu


def _round_up(x, m):
    return (x + m - 1) // m * m


def random_apply_kernel(coef_ref, x_ref, o_ref):
    # coef_ref : VMEM f32, (grid*block_rows, 2) resident  OR  (block_rows, 2) blocked
    # x_ref/o_ref : VMEM (block_rows, hw_p), lane-dense image rows
    br = x_ref.shape[0]
    if coef_ref.shape[0] == br:
        # Per-step blocked coefficients (large-rows fallback, or single-step grid).
        c = coef_ref[...]
    else:
        # Whole coefficient table is resident; slice this step's rows.
        i = pl.multiple_of(pl.program_id(0) * br, br)
        c = coef_ref[pl.ds(i, br), :]
    a = c[:, 0:1]                                   # (br, 1) f32
    b = c[:, 1:2]                                   # (br, 1) f32
    # Keep the math in f32 (coefs stay f32); cast once on store. Mem-bound, so free.
    o_ref[...] = (a * x_ref[...].astype(jnp.float32) + b).astype(o_ref.dtype)


def _target_block_bytes():
    """Per-generation x/out block size target (bytes)."""
    kind = ""
    try:
        kind = jax.devices()[0].device_kind.lower()
    except Exception:
        pass
    if any(v in kind for v in ("v2", "v3", "v4", "v5")):
        # v5e: 16 MiB default scoped VMEM; 2 MiB blocks -> 2 arrays x 2 bufs = 8 MiB.
        return 2 << 20
    if "v7" in kind or "7x" in kind:
        # v7x: 64 MiB VMEM but 3.2 TB/s HBM -> bigger blocks to hide the
        # ~0.35 us/step overhead; 6 MiB blocks -> 24 MiB of x/out buffers.
        return 6 << 20
    # v6e (and default): 4 MiB blocks -> 16 MiB, inside the 32 MiB scoped default.
    return 4 << 20


def _pick_block_rows(rows, hw_p, itemsize, target_bytes):
    """Largest dtype-aligned row tile fitting target_bytes, with >= 2 grid steps
    whenever the row count allows (so v7x's second TensorCore gets work)."""
    sub = 8 * max(1, 4 // itemsize)              # f32: 8, bf16: 16, int8/fp8: 32
    br = max(sub, (target_bytes // (hw_p * itemsize)) // sub * sub)
    rows_sub = _round_up(rows, sub)
    br = min(br, rows_sub)
    if br >= rows_sub and rows_sub >= 2 * sub:
        br = _round_up(rows_sub // 2, sub)       # split once -> >= 2 balanced steps
    return br


def random_apply(x, gamma, beta, mask):
    """x: (B,C,H,W); gamma,beta: (C,); mask: (B,) float {0,1}."""
    B, C, H, W = x.shape
    rows, hw = B * C, H * W
    itemsize = jnp.dtype(x.dtype).itemsize

    # ---- fold mask + per-channel affine into per-(batch,channel) f32 coefs ----
    m = mask.astype(jnp.float32).reshape(B, 1)
    g = gamma.astype(jnp.float32).reshape(1, C)
    bt = beta.astype(jnp.float32).reshape(1, C)
    a_coef = (1.0 + m * (g - 1.0)).reshape(rows)
    b_coef = (m * bt).reshape(rows)
    coef = jnp.stack([a_coef, b_coef], axis=-1)              # (rows, 2) f32

    # ---- lane-dense flattening; pad minor dim to a multiple of 128 if needed ----
    x2 = x.reshape(rows, hw)
    hw_p = _round_up(hw, 128)
    if hw_p != hw:
        x2 = jnp.pad(x2, ((0, 0), (0, hw_p - hw)))           # keep stores unmasked

    # ---- tile sizing (per TPU generation) and grid ----
    block_rows = _pick_block_rows(rows, hw_p, itemsize, _target_block_bytes())
    grid_len = pl.cdiv(rows, block_rows)                     # partial last block masked

    # Pad coefficients to full grid coverage so the in-kernel pl.ds never OOBs.
    rows_coef = grid_len * block_rows
    if rows_coef != rows:
        coef = jnp.pad(coef, ((0, rows_coef - rows), (0, 0)))

    # Keep the tiny coef table resident in VMEM (fetched once, sliced per step)
    # unless it would crowd out the x/out blocks; lane-padded footprint/row = 512 B.
    coef_buf_bytes = _round_up(rows_coef, 8) * 128 * 4
    if coef_buf_bytes <= (2 << 20):
        coef_spec = pl.BlockSpec((rows_coef, 2), lambda i: (0, 0))
    else:
        coef_spec = pl.BlockSpec((block_rows, 2), lambda i: (i, 0))
        coef_buf_bytes = _round_up(block_rows, 8) * 128 * 4

    # ---- VMEM budget: 2 pipeline buffers x (x block + out block) + coefs ----
    blk_bytes = block_rows * hw_p * itemsize
    need = 4 * blk_bytes + 2 * coef_buf_bytes + (4 << 20)    # + compiler headroom
    vmem_limit = int(max(16 << 20, min(48 << 20, need)))     # safe on v5e/v6e/v7x

    out2 = pl.pallas_call(
        random_apply_kernel,
        out_shape=jax.ShapeDtypeStruct((rows, hw_p), x.dtype),
        grid=(grid_len,),
        in_specs=[
            coef_spec,                                          # per-row (a, b) f32
            pl.BlockSpec((block_rows, hw_p), lambda i: (i, 0)),  # x rows
        ],
        out_specs=pl.BlockSpec((block_rows, hw_p), lambda i: (i, 0)),
        input_output_aliases={1: 0},                            # donate x2 -> out
        compiler_params=pltpu.CompilerParams(
            dimension_semantics=("parallel",),
            vmem_limit_bytes=vmem_limit),
    )(coef, x2)

    if hw_p != hw:
        out2 = out2[:, :hw]
    return out2.reshape(B, C, H, W)


if __name__ == "__main__":
    B, C, H, W = 2, 4, 16, 16
    p = 0.5

    key = jax.random.PRNGKey(0)
    kx, km = jax.random.split(key)

    x = jax.random.normal(kx, (B, C, H, W), dtype=jnp.float32)

    # Deterministic parameters for fn (per-channel affine augmentation).
    gamma = 1.0 + 0.1 * jnp.arange(C, dtype=jnp.float32)
    beta = 0.01 * jnp.arange(C, dtype=jnp.float32)

    # torch.bernoulli(inputs.new_full((B,), p)) equivalent, deterministic seed.
    mask = jax.random.bernoulli(km, p, (B,)).astype(jnp.float32)

    # Pure-JAX reference of the same forward pass (computed before the kernel).
    m4 = mask.reshape(B, 1, 1, 1)
    fx = gamma.reshape(1, C, 1, 1) * x + beta.reshape(1, C, 1, 1)
    ref = x * (1.0 - m4) + fx * m4

    out = random_apply(x, gamma, beta, mask)
    jax.block_until_ready(out)

    assert out.shape == (B, C, H, W) and out.dtype == x.dtype
    assert jnp.allclose(out, ref, atol=1e-5, rtol=1e-5), "mismatch vs reference"

    print("KERNEL_OK")
</pallas_src>

<mosaic_0001>
module attributes {stable_mosaic.version = 11 : i64} {
  func.func @random_apply_kernel(%arg0: i32, %arg1: memref<8x2xf32, #tpu.memory_space<vmem>>, %arg2: memref<8x256xf32, #tpu.memory_space<vmem>>, %arg3: memref<8x256xf32, #tpu.memory_space<vmem>>) attributes {dimension_semantics = [#tpu.dimension_semantics<parallel>], iteration_bounds = array<i64: 1>, scalar_prefetch = 0 : i64, scratch_operands = 0 : i64, tpu.core_type = #tpu.core_type<tc>, window_params = [{pipeline_mode = #tpu.pipeline_mode<synchronous>, transform_indices = @transform_0, window_bounds = array<i64: 8, 2>}, {transform_indices = @transform_1, window_bounds = array<i64: 8, 256>}, {transform_indices = @transform_2, window_bounds = array<i64: 8, 256>}]} {
    %c0 = arith.constant 0 : index
    %c0_0 = arith.constant 0 : index
    %0 = vector.load %arg1[%c0, %c0_0] : memref<8x2xf32, #tpu.memory_space<vmem>>, vector<8x2xf32>
    %1 = vector.extract_strided_slice %0 {offsets = [0, 0], sizes = [8, 1], strides = [1, 1]} : vector<8x2xf32> to vector<8x1xf32>
    %2 = vector.extract_strided_slice %0 {offsets = [0, 1], sizes = [8, 1], strides = [1, 1]} : vector<8x2xf32> to vector<8x1xf32>
    %c0_1 = arith.constant 0 : index
    %c0_2 = arith.constant 0 : index
    %3 = vector.load %arg2[%c0_1, %c0_2] : memref<8x256xf32, #tpu.memory_space<vmem>>, vector<8x256xf32>
    %4 = vector.broadcast %1 : vector<8x1xf32> to vector<8x256xf32>
    %5 = arith.mulf %4, %3 : vector<8x256xf32>
    %6 = vector.broadcast %2 : vector<8x1xf32> to vector<8x256xf32>
    %7 = arith.addf %5, %6 : vector<8x256xf32>
    %c0_3 = arith.constant 0 : index
    %c0_4 = arith.constant 0 : index
    %8 = vector.load %arg3[%c0_3, %c0_4] : memref<8x256xf32, #tpu.memory_space<vmem>>, vector<8x256xf32>
    tpu.vector_store %arg3[%c0_3, %c0_4], %7 {strides = array<i32>} : memref<8x256xf32, #tpu.memory_space<vmem>>, vector<8x256xf32>,
    return
  }
  func.func @transform_0(%arg0: i32) -> (i32, i32) {
    %c0_i32 = arith.constant 0 : i32
    %c0_i32_0 = arith.constant 0 : i32
    %c0_i32_1 = arith.constant 0 : i32
    return %c0_i32, %c0_i32_0 : i32, i32
  }
  func.func @transform_1(%arg0: i32) -> (i32, i32) {
    %c0_i32 = arith.constant 0 : i32
    %c0_i32_0 = arith.constant 0 : i32
    return %arg0, %c0_i32 : i32, i32
  }
  func.func @transform_2(%arg0: i32) -> (i32, i32) {
    %c0_i32 = arith.constant 0 : i32
    %c0_i32_0 = arith.constant 0 : i32
    return %arg0, %c0_i32 : i32, i32
  }
}

</mosaic_0001>

<bundles_post_ra>
// kernel: tpu_custom_call.1
= control target key start
LH: loop header
LB: loop body
LE: loop exit
PB: predicated region body
PF: predicated region fallthrough
CT: control target
= control target key end

     0   :  { %7 = vsyncpa [#allocation3], 0  ;;  %s157_s0 = inlined_call_operand.vmem [shape: f32[8,2], index: 0, kind: input, shape index: {}]   ;;  %s158_s1 = inlined_call_operand.hbm [shape: f32[8,256], index: 1, kind: input, shape index: {}, may-alias: {1,2}]   ;;  %s159_s2 = inlined_call_operand.hbm [shape: f32[8,256], index: 2, kind: output, shape index: {}, may-alias: {1,2}]  }
   0x1   :  { %8 = vsyncpa [#allocation4], 0  ;;  %s111_s9 = smov [#allocation2]   ;;  %s63_s13 = scalar_lea.hbm %s158_s1, 256 }
   0x2   :  { %s17_s10 = sshll.u32 %s111_s9, 4  ;;  %p64_p0 = scmp.ne.s32.totalorder %s158_s1, %s63_s13  ;;  %s18_s10 = int_to_ptr.vmem [resolvable:$true] %s17_s10 }
   0x3   :  { %p67_p1 = scmp.lt.u32.totalorder %s63_s13, %s158_s1 }
   0x5   :  { %p69_p2 = pnand %p67_p1, %p64_p0 }
   0x7   :  { %72 = shalt.err (!%p69_p2)
}
   0x8   :  { %s73_s18 = scalar_lea.vmem %s18_s10, 256  ;;  %p78_p4 = scmp.lt.s32.totalorder %s18_s10, %s18_s10 }
   0x9   :  { %p74_p3 = scmp.ne.s32.totalorder %s18_s10, %s73_s18  ;;  %p79_p5 = scmp.lt.s32.totalorder %s73_s18, %s73_s18 }
   0xb   :  { %p80_p6 = por %p79_p5, %p78_p4 }
   0xd   :  { %p81_p7 = pnand %p80_p6, %p74_p3 }
   0xf   :  { %84 = shalt.err (!%p81_p7)
}
  0x10   :  { %20 = dma.hbm_to_vmem [thread:$0]  %s158_s1, 256, %s18_s10, [#allocation3]  }
  0x11   :  { %107 = dma.done.wait [#allocation3], 256  }
  0x12   :  { %108 = vsyncadd [#allocation3], 4294967040  ;;  %v112_v0 = vmov 0   ;;  %v24_v1 = vld [vmem:[%s157_s0] sm:$0xff]  ;;  %v113_v2 = vmov 1   ;;  %v26_v5 = vld [vmem:[#allocation2 + $0x8] sm:$0xff] }
  0x13   :  { %61 = vset.pattern.permute.xlu0 %v112_v0  ;;  %v25_v4 = vld [vmem:[#allocation2] sm:$0xff]  ;;  %s114_s23 = smov [#allocation5]  }
  0x14   :  { %29 = vperm.xlu0 %61, %v24_v1   ;;  %s48_s24 = sshll.u32 %s114_s23, 4  ;;  %s49_s24 = int_to_ptr.vmem [resolvable:$true] %s48_s24 }
  0x15   :  { %s85_s1 = scalar_lea.vmem %s49_s24, 256  ;;  %p90_p9 = scmp.lt.s32.totalorder %s49_s24, %s49_s24 }
  0x16   :  { %p86_p8 = scmp.ne.s32.totalorder %s49_s24, %s85_s1  ;;  %p91_p10 = scmp.lt.s32.totalorder %s85_s1, %s85_s1 }
  0x18   :  { %62 = vset.pattern.permute.xlu0 %v113_v2  ;;  %p92_p11 = por %p91_p10, %p90_p9 }
  0x19   :  { %35 = vperm.xlu0 %62, %v24_v1  }
  0x1a   :  { %p93_p12 = pnand %p92_p11, %p86_p8 }
  0x93   :  { %v30_v3 = vpop.permute.xlu0 %29 }
  0x94   :  { %v32_v6 = vmul.f32 %v30_v3, %v25_v4  ;;  %v33_v7 = vmul.f32 %v30_v3, %v26_v5 }
  0x98   :  { %v36_v8 = vpop.permute.xlu0 %35 }
  0x99   :  { %v38_v9 = vadd.f32 %v36_v8, %v32_v6  ;;  %v39_v10 = vadd.f32 %v36_v8, %v33_v7 }
  0x9b   :  { %40 = vst [vmem:[#allocation5] sm:$0xff] %v38_v9  ;;  %41 = vst [vmem:[#allocation5 + $0x8] sm:$0xff] %v39_v10 }
  0x9c   :  { %96 = shalt.err (!%p93_p12)
}
  0x9d   :  { %s97_s26 = scalar_lea.hbm %s159_s2, 256 }
  0x9e   :  { %p98_p13 = scmp.ne.s32.totalorder %s159_s2, %s97_s26  ;;  %p101_p0 = scmp.lt.u32.totalorder %s97_s26, %s159_s2 }
  0xa0   :  { %p103_p1 = pnand %p101_p0, %p98_p13 }
  0xa2   :  { %106 = shalt.err (!%p103_p1)
}
  0xa3   :  { %51 = dma.vmem_to_hbm [thread:$0]  %s49_s24, 256, %s159_s2, [#allocation4]  }
  0xa4   :  { %109 = dma.done.wait [#allocation4], 256  }
  0xa5   :  { %110 = vsyncadd [#allocation4], 4294967040 }
  0xa6   :  { %55 = vsyncpa [#allocation3], 1 }
  0xa7   :  { %56 = vsyncpa [#allocation4], 1 }

</bundles_post_ra>
